<compile_context>
chip_gen: v6e
topology: v6e:2x2x1
jax: 0.10.0
libtpu: 0.0.40
codegen_flags: <defaults>
</compile_context>

<pallas_src>
import math

import jax
import jax.numpy as jnp
from jax.experimental import pallas as pl
from jax.experimental.pallas import tpu as pltpu


def _bce_dice_sums_kernel(x_ref, t_ref, acc_ref):
    """Accumulates per-sample lane-wise partial sums over row-blocks.

    acc_ref row 0: elementwise BCE-with-logits terms
    acc_ref row 1: sigmoid(x)
    acc_ref row 2: target
    acc_ref row 3: sigmoid(x) * target   (intersection)
    rows 4..7 unused (kept for 8-sublane alignment)
    """
    r = pl.program_id(1)

    @pl.when(r == 0)
    def _():
        acc_ref[...] = jnp.zeros_like(acc_ref)

    x = x_ref[...].astype(jnp.float32)
    t = t_ref[...].astype(jnp.float32)

    # exp(-|x|) computed once, reused for BCE and sigmoid (saves EUP slots).
    e = jnp.exp(-jnp.abs(x))

    # Numerically stable binary_cross_entropy_with_logits (elementwise):
    #   max(x, 0) - x*t + log(1 + exp(-|x|))
    bce = jnp.maximum(x, 0.0) - x * t + jnp.log1p(e)

    # sigmoid(x) = where(x >= 0, 1, e) / (1 + e). Exact reciprocal keeps 1e-5
    # fidelity; switch to approx=True if ~1e-3 relative error is acceptable.
    p = jnp.where(x >= 0.0, 1.0, e) * pl.reciprocal(1.0 + e, approx=False)

    # Sublane-only reductions; cross-lane reduction deferred to the wrapper.
    acc_ref[0:1, :] += jnp.sum(bce, axis=0, keepdims=True)
    acc_ref[1:2, :] += jnp.sum(p, axis=0, keepdims=True)
    acc_ref[2:3, :] += jnp.sum(t, axis=0, keepdims=True)
    acc_ref[3:4, :] += jnp.sum(p * t, axis=0, keepdims=True)


def bce_dice_loss(logits, target):
    """Pallas implementation of BCEDiceLoss.forward(input, target)."""
    assert logits.shape == target.shape
    N = logits.shape[0]
    D = math.prod(logits.shape[1:])

    # Lane width: multiple of 128, capped at 512.
    W = min(512, -(-D // 128) * 128)
    rows_raw = -(-D // W)

    # Row-block size: multiple of 8; cap so each input tile is <= 4 MiB f32
    # (2 inputs x 2 pipeline buffers ~ 16 MiB VMEM, safe on all generations).
    TR_CAP = 2048
    if rows_raw <= TR_CAP:
        TR = -(-rows_raw // 8) * 8
        R = TR
    else:
        TR = TR_CAP
        R = -(-rows_raw // TR) * TR
    D_pad = R * W

    x = logits.reshape(N, D).astype(jnp.float32)
    t = target.reshape(N, D).astype(jnp.float32)
    if D_pad != D:
        # Pad logits with a large negative value and targets with zero so the
        # pad region contributes exactly 0 to every partial sum (no masking).
        x = jnp.pad(x, ((0, 0), (0, D_pad - D)), constant_values=-1e9)
        t = jnp.pad(t, ((0, 0), (0, D_pad - D)), constant_values=0.0)
    x = x.reshape(N, R, W)
    t = t.reshape(N, R, W)

    grid = (N, R // TR)

    partials = pl.pallas_call(
        _bce_dice_sums_kernel,
        out_shape=jax.ShapeDtypeStruct((N, 8, W), jnp.float32),
        grid_spec=pltpu.PrefetchScalarGridSpec(
            num_scalar_prefetch=0,
            grid=grid,
            in_specs=[
                pl.BlockSpec((None, TR, W), lambda n, r: (n, r, 0)),
                pl.BlockSpec((None, TR, W), lambda n, r: (n, r, 0)),
            ],
            # Resident accumulator block per sample (constant over r).
            out_specs=pl.BlockSpec((None, 8, W), lambda n, r: (n, 0, 0)),
        ),
        compiler_params=pltpu.CompilerParams(
            dimension_semantics=("parallel", "arbitrary"),
            vmem_limit_bytes=48 * 1024 * 1024,
        ),
    )(x, t)

    # Final cross-lane reduction + scalar epilogue in plain JAX (tiny).
    sums = jnp.sum(partials[:, 0:4, :], axis=-1)            # (N, 4)
    smooth = 1e-05
    bce = jnp.sum(sums[:, 0]) / (N * D)                      # mean over real elements
    dice = (2.0 * sums[:, 3] + smooth) / (sums[:, 1] + sums[:, 2] + smooth)
    dice = 1.0 - jnp.sum(dice) / N
    return 0.5 * bce + dice


def _reference(logits, target):
    # Pure-JAX reference mirroring the PyTorch forward, for sanity checking.
    x = logits.astype(jnp.float32)
    t = target.astype(jnp.float32)
    bce = jnp.mean(jnp.maximum(x, 0.0) - x * t + jnp.log1p(jnp.exp(-jnp.abs(x))))
    smooth = 1e-05
    N = x.shape[0]
    p = jax.nn.sigmoid(x).reshape(N, -1)
    tt = t.reshape(N, -1)
    inter = (p * tt).sum(1)
    dice = (2.0 * inter + smooth) / (p.sum(1) + tt.sum(1) + smooth)
    dice = 1.0 - dice.sum() / N
    return 0.5 * bce + dice


if __name__ == "__main__":
    key = jax.random.PRNGKey(0)
    k1, k2 = jax.random.split(key)
    # NCHW, as the PyTorch module would receive from a segmentation net.
    logits = jax.random.normal(k1, (2, 4, 16, 16), dtype=jnp.float32)
    target = jax.random.uniform(k2, (2, 4, 16, 16), dtype=jnp.float32)

    loss = bce_dice_loss(logits, target)
    loss = jax.block_until_ready(loss)

    ref = _reference(logits, target)
    assert jnp.allclose(loss, ref, rtol=1e-5, atol=1e-5), (loss, ref)

    print("KERNEL_OK")
</pallas_src>

<mosaic_0001>
module attributes {stable_mosaic.version = 11 : i64} {
  func.func @_bce_dice_sums_kernel(%arg0: i32, %arg1: i32, %arg2: memref<1x8x512xf32, #tpu.memory_space<vmem>>, %arg3: memref<1x8x512xf32, #tpu.memory_space<vmem>>, %arg4: memref<1x8x512xf32, #tpu.memory_space<vmem>>) attributes {dimension_semantics = [#tpu.dimension_semantics<parallel>, #tpu.dimension_semantics<arbitrary>], iteration_bounds = array<i64: 2, 1>, scalar_prefetch = 0 : i64, scratch_operands = 0 : i64, tpu.core_type = #tpu.core_type<tc>, window_params = [{transform_indices = @transform_0, window_bounds = array<i64: 1, 8, 512>}, {transform_indices = @transform_1, window_bounds = array<i64: 1, 8, 512>}, {transform_indices = @transform_2, window_bounds = array<i64: 1, 8, 512>}]} {
    %c0_i32 = arith.constant 0 : i32
    %0 = arith.cmpi eq, %arg1, %c0_i32 : i32
    %1 = arith.extui %0 : i1 to i32
    %c0_i32_0 = arith.constant 0 : i32
    %2 = arith.cmpi ne, %1, %c0_i32_0 : i32
    scf.if %2 {
      %cst_35 = arith.constant 0.000000e+00 : f32
      %58 = vector.broadcast %cst_35 : f32 to vector<8x512xf32>
      %c0_36 = arith.constant 0 : index
      %c0_37 = arith.constant 0 : index
      %c0_38 = arith.constant 0 : index
      %59 = vector.load %arg4[%c0_36, %c0_37, %c0_38] : memref<1x8x512xf32, #tpu.memory_space<vmem>>, vector<1x8x512xf32>
      %60 = vector.shape_cast %59 : vector<1x8x512xf32> to vector<8x512xf32>
      %61 = vector.shape_cast %58 : vector<8x512xf32> to vector<1x8x512xf32>
      tpu.vector_store %arg4[%c0_36, %c0_37, %c0_38], %61 {strides = array<i32>} : memref<1x8x512xf32, #tpu.memory_space<vmem>>, vector<1x8x512xf32>,
    } else {
    }
    %c0 = arith.constant 0 : index
    %c0_1 = arith.constant 0 : index
    %c0_2 = arith.constant 0 : index
    %3 = vector.load %arg2[%c0, %c0_1, %c0_2] : memref<1x8x512xf32, #tpu.memory_space<vmem>>, vector<1x8x512xf32>
    %4 = vector.shape_cast %3 : vector<1x8x512xf32> to vector<8x512xf32>
    %c0_3 = arith.constant 0 : index
    %c0_4 = arith.constant 0 : index
    %c0_5 = arith.constant 0 : index
    %5 = vector.load %arg3[%c0_3, %c0_4, %c0_5] : memref<1x8x512xf32, #tpu.memory_space<vmem>>, vector<1x8x512xf32>
    %6 = vector.shape_cast %5 : vector<1x8x512xf32> to vector<8x512xf32>
    %7 = math.absf %4 : vector<8x512xf32>
    %cst = arith.constant 0.000000e+00 : f32
    %8 = vector.broadcast %cst : f32 to vector<8x512xf32>
    %9 = arith.subf %8, %7 : vector<8x512xf32>
    %10 = math.exp %9 : vector<8x512xf32>
    %cst_6 = arith.constant 0.000000e+00 : f32
    %11 = vector.broadcast %cst_6 : f32 to vector<8x512xf32>
    %12 = arith.maximumf %4, %11 : vector<8x512xf32>
    %13 = arith.mulf %4, %6 : vector<8x512xf32>
    %14 = arith.subf %12, %13 : vector<8x512xf32>
    %15 = math.log1p %10 : vector<8x512xf32>
    %16 = arith.addf %14, %15 : vector<8x512xf32>
    %cst_7 = arith.constant 0.000000e+00 : f32
    %17 = vector.broadcast %cst_7 : f32 to vector<8x512xf32>
    %18 = arith.cmpf oge, %4, %17 : vector<8x512xf32>
    %cst_8 = arith.constant 1.000000e+00 : f32
    %19 = vector.broadcast %cst_8 : f32 to vector<8x512xf32>
    %20 = arith.select %18, %19, %10 : vector<8x512xi1>, vector<8x512xf32>
    %cst_9 = arith.constant 1.000000e+00 : f32
    %21 = vector.broadcast %cst_9 : f32 to vector<8x512xf32>
    %22 = arith.addf %21, %10 : vector<8x512xf32>
    %23 = tpu.reciprocal %22 : vector<8x512xf32> -> vector<8x512xf32>
    %24 = arith.mulf %20, %23 : vector<8x512xf32>
    %c0_10 = arith.constant 0 : index
    %c0_11 = arith.constant 0 : index
    %c0_12 = arith.constant 0 : index
    %25 = vector.load %arg4[%c0_10, %c0_11, %c0_12] : memref<1x8x512xf32, #tpu.memory_space<vmem>>, vector<1x1x512xf32>
    %26 = vector.shape_cast %25 : vector<1x1x512xf32> to vector<1x512xf32>
    %cst_13 = arith.constant dense<0.000000e+00> : vector<512xf32>
    %27 = vector.multi_reduction <add>, %16, %cst_13 [0] : vector<8x512xf32> to vector<512xf32>
    %28 = vector.shape_cast %27 : vector<512xf32> to vector<1x512xf32>
    %29 = arith.addf %26, %28 : vector<1x512xf32>
    %c0_14 = arith.constant 0 : index
    %c0_15 = arith.constant 0 : index
    %c0_16 = arith.constant 0 : index
    %30 = vector.load %arg4[%c0_14, %c0_15, %c0_16] : memref<1x8x512xf32, #tpu.memory_space<vmem>>, vector<1x1x512xf32>
    %31 = vector.shape_cast %30 : vector<1x1x512xf32> to vector<1x512xf32>
    %32 = vector.shape_cast %29 : vector<1x512xf32> to vector<1x1x512xf32>
    tpu.vector_store %arg4[%c0_14, %c0_15, %c0_16], %32 {strides = array<i32>} : memref<1x8x512xf32, #tpu.memory_space<vmem>>, vector<1x1x512xf32>,
    %c0_17 = arith.constant 0 : index
    %c1 = arith.constant 1 : index
    %c0_18 = arith.constant 0 : index
    %33 = vector.load %arg4[%c0_17, %c1, %c0_18] : memref<1x8x512xf32, #tpu.memory_space<vmem>>, vector<1x1x512xf32>
    %34 = vector.shape_cast %33 : vector<1x1x512xf32> to vector<1x512xf32>
    %cst_19 = arith.constant dense<0.000000e+00> : vector<512xf32>
    %35 = vector.multi_reduction <add>, %24, %cst_19 [0] : vector<8x512xf32> to vector<512xf32>
    %36 = vector.shape_cast %35 : vector<512xf32> to vector<1x512xf32>
    %37 = arith.addf %34, %36 : vector<1x512xf32>
    %c0_20 = arith.constant 0 : index
    %c1_21 = arith.constant 1 : index
    %c0_22 = arith.constant 0 : index
    %38 = vector.load %arg4[%c0_20, %c1_21, %c0_22] : memref<1x8x512xf32, #tpu.memory_space<vmem>>, vector<1x1x512xf32>
    %39 = vector.shape_cast %38 : vector<1x1x512xf32> to vector<1x512xf32>
    %40 = vector.shape_cast %37 : vector<1x512xf32> to vector<1x1x512xf32>
    tpu.vector_store %arg4[%c0_20, %c1_21, %c0_22], %40 {strides = array<i32>} : memref<1x8x512xf32, #tpu.memory_space<vmem>>, vector<1x1x512xf32>,
    %c0_23 = arith.constant 0 : index
    %c2 = arith.constant 2 : index
    %c0_24 = arith.constant 0 : index
    %41 = vector.load %arg4[%c0_23, %c2, %c0_24] : memref<1x8x512xf32, #tpu.memory_space<vmem>>, vector<1x1x512xf32>
    %42 = vector.shape_cast %41 : vector<1x1x512xf32> to vector<1x512xf32>
    %cst_25 = arith.constant dense<0.000000e+00> : vector<512xf32>
    %43 = vector.multi_reduction <add>, %6, %cst_25 [0] : vector<8x512xf32> to vector<512xf32>
    %44 = vector.shape_cast %43 : vector<512xf32> to vector<1x512xf32>
    %45 = arith.addf %42, %44 : vector<1x512xf32>
    %c0_26 = arith.constant 0 : index
    %c2_27 = arith.constant 2 : index
    %c0_28 = arith.constant 0 : index
    %46 = vector.load %arg4[%c0_26, %c2_27, %c0_28] : memref<1x8x512xf32, #tpu.memory_space<vmem>>, vector<1x1x512xf32>
    %47 = vector.shape_cast %46 : vector<1x1x512xf32> to vector<1x512xf32>
    %48 = vector.shape_cast %45 : vector<1x512xf32> to vector<1x1x512xf32>
    tpu.vector_store %arg4[%c0_26, %c2_27, %c0_28], %48 {strides = array<i32>} : memref<1x8x512xf32, #tpu.memory_space<vmem>>, vector<1x1x512xf32>,
    %c0_29 = arith.constant 0 : index
    %c3 = arith.constant 3 : index
    %c0_30 = arith.constant 0 : index
    %49 = vector.load %arg4[%c0_29, %c3, %c0_30] : memref<1x8x512xf32, #tpu.memory_space<vmem>>, vector<1x1x512xf32>
    %50 = vector.shape_cast %49 : vector<1x1x512xf32> to vector<1x512xf32>
    %51 = arith.mulf %24, %6 : vector<8x512xf32>
    %cst_31 = arith.constant dense<0.000000e+00> : vector<512xf32>
    %52 = vector.multi_reduction <add>, %51, %cst_31 [0] : vector<8x512xf32> to vector<512xf32>
    %53 = vector.shape_cast %52 : vector<512xf32> to vector<1x512xf32>
    %54 = arith.addf %50, %53 : vector<1x512xf32>
    %c0_32 = arith.constant 0 : index
    %c3_33 = arith.constant 3 : index
    %c0_34 = arith.constant 0 : index
    %55 = vector.load %arg4[%c0_32, %c3_33, %c0_34] : memref<1x8x512xf32, #tpu.memory_space<vmem>>, vector<1x1x512xf32>
    %56 = vector.shape_cast %55 : vector<1x1x512xf32> to vector<1x512xf32>
    %57 = vector.shape_cast %54 : vector<1x512xf32> to vector<1x1x512xf32>
    tpu.vector_store %arg4[%c0_32, %c3_33, %c0_34], %57 {strides = array<i32>} : memref<1x8x512xf32, #tpu.memory_space<vmem>>, vector<1x1x512xf32>,
    return
  }
  func.func @transform_0(%arg0: i32, %arg1: i32) -> (i32, i32, i32) {
    %c0_i32 = arith.constant 0 : i32
    %c0_i32_0 = arith.constant 0 : i32
    return %arg0, %arg1, %c0_i32 : i32, i32, i32
  }
  func.func @transform_1(%arg0: i32, %arg1: i32) -> (i32, i32, i32) {
    %c0_i32 = arith.constant 0 : i32
    %c0_i32_0 = arith.constant 0 : i32
    return %arg0, %arg1, %c0_i32 : i32, i32, i32
  }
  func.func @transform_2(%arg0: i32, %arg1: i32) -> (i32, i32, i32) {
    %c0_i32 = arith.constant 0 : i32
    %c0_i32_0 = arith.constant 0 : i32
    %c0_i32_1 = arith.constant 0 : i32
    return %arg0, %c0_i32, %c0_i32_0 : i32, i32, i32
  }
}

</mosaic_0001>

<bundles_post_ra>
// kernel: tpu_custom_call.1
= control target key start
LH: loop header
LB: loop body
LE: loop exit
PB: predicated region body
PF: predicated region fallthrough
CT: control target
= control target key end

     0   :  { %7 = vsyncpa [#allocation3], 0  ;;  %s1276_s0 = inlined_call_operand.hbm [shape: f32[2,8,512], index: 0, kind: input, shape index: {}]   ;;  %s1277_s1 = inlined_call_operand.hbm [shape: f32[2,8,512], index: 1, kind: input, shape index: {}]   ;;  %s1278_s2 = inlined_call_operand.hbm [shape: f32[2,8,512], index: 2, kind: output, shape index: {}]  }
   0x1   :  { %9 = vsyncpa [#allocation3 + $0x1], 0 }
   0x2   :  { %10 = vsyncpa [#allocation6], 0 }
   0x3   :  { %12 = vsyncpa [#allocation6 + $0x1], 0 }
   0x4   :  { %13 = vsyncpa [#allocation4], 0 }
   0x5   :  { %15 = vsyncpa [#allocation4 + $0x1], 0  ;;  %s966_s9 = smov 0   ;;  %s968_s10 = smov 0  }
   0x6   :  { %s970_s11 = smov 0   ;;  %s972_s12 = smov 0  }
   0x7   :  { %s974_s13 = smov 0   ;;  %s976_s14 = smov 0  }
   0x8 LB: > { %s683_s15 = sadd.s32 4294967295, %s944_s14   ;;  %s684_s16 = sadd.s32 4294967294, %s944_s14   ;;  %s944_s14 = sphi %s976_s14, %s21_s14   ;;  %s940_s13 = sphi %s974_s13, %s1300_s13   ;;  %s936_s12 = sphi %s972_s12, %s1299_s12   ;;  %s932_s11 = sphi %s970_s11, %s1298_s11   ;;  %s928_s10 = sphi %s968_s10, %s1297_s10   ;;  %s924_s9 = sphi %s966_s9, %s1296_s9  }
   0x9   : > { %s33_s17 = sadd.s32 1, %s940_s13  ;;  %s42_s18 = sadd.s32 1, %s932_s11 }
   0xa   : > { %p35_p0 = scmp.ge.s32.totalorder %s33_s17, 2  ;;  %p49_p1 = scmp.ne.s32.totalorder %s932_s11, %s928_s10 }
   0xb   : > { %p50_p2 = scmp.eq.s32.totalorder %s944_s14, 0  ;;  %p55_p3 = scmp.ne.s32.totalorder %s928_s10, %s924_s9 }
   0xc   : > { %s1302_s17 = smov (%p35_p0, %s33_s17), 0  ;;  %p56_p5 = scmp.eq.s32.totalorder %s683_s15, 0 }
   0xd   : > { %p1007_p4 = por %p50_p2, %p49_p1  ;;  %s37_s20 = ssub.s32 %s940_s13, %s1302_s17 }
   0xe   : > { %p107_p6 = scmp.eq.s32.totalorder %s683_s15, 1  ;;  %p40_p7 = scmp.eq.s32.totalorder %s37_s20, 0 }
   0xf   : > { %p1013_p8 = por %p56_p5, %p55_p3  ;;  %p113_p10 = scmp.eq.s32.totalorder %s684_s16, 1 }
  0x10   : > { %p1017_p9 = por %p107_p6, %p49_p1  ;;  %p728_p13 = scmp.lt.s32.totalorder %s944_s14, 2 }
  0x11   : > { %s1022_s23 = scalar_select %p40_p7, %s932_s11, %s42_s18  }
  0x12   : > { %p1024_p11 = por %p113_p10, %p55_p3  ;;  %s1031_s25 = sand.u32 1, %s932_s11  }
  0x13   : > { %s687_s26 = sshll.u32 %s1031_s25, 5  ;;  %s708_s27 = sshll.u32 %s940_s13, 9 }
  0x14   : > { %s145_s30 = scalar_lea.hbm %s1276_s0, %s708_s27  ;;  %s137_s3 = scalar_lea.vmem [#allocation2], %s687_s26 }
  0x15   : > { %s147_s4 = sshll.u32 %s137_s3, 4  ;;  %p1040_p0 = pnand %p728_p13, %p1007_p4  ;;  %s148_s4 = int_to_ptr.vmem [resolvable:$true] %s147_s4 }
  0x16   : > { %p693_p1 = scmp.ge.s32.totalorder %s944_s14, 1  ;;  %p173_p2 = scmp.lt.s32.totalorder %s944_s14, 3 }
  0x17   : > { %s134_s6 = scalar_lea.sflag [#allocation3], %s1031_s25  ;;  %p806_p3 = pneg %p1040_p0 }
  0x18   : > { %s817_s7 = scalar_lea.vmem %s148_s4, 512  ;;  %s946_s8 = smov [#allocation2]  }
  0x19   : > { %p818_p5 = scmp.ne.s32.totalorder %s148_s4, %s817_s7  ;;  %s822_s15 = sshll.u32 %s946_s8, 4  ;;  %s823_s15 = int_to_ptr.vmem [resolvable:$false] %s822_s15 }
  0x1a   : > { %s824_s16 = scalar_lea.vmem %s823_s15, 1024  ;;  %p825_p4 = scmp.lt.s32.totalorder %s148_s4, %s823_s15 }
  0x1b   : > { %p820_p6 = pnand %p818_p5, %p806_p3  ;;  %p826_p10 = scmp.lt.s32.totalorder %s824_s16, %s817_s7 }
  0x1d   : > { %p821_p7 = pneg %p820_p6  ;;  %p827_p13 = por %p826_p10, %p825_p4 }
  0x1f   : > { %p828_p12 = pnand %p827_p13, %p821_p7 }
  0x21   : > { %831 = shalt.err (!%p828_p12)
}
  0x22   : > { %720 = dma.hbm_to_vmem [thread:$0]  (!%p1040_p0), %s145_s30, 512, %s148_s4, %s134_s6  }
  0x23   : > { %p1058_p5 = pnand %p693_p1, %p173_p2  ;;  %s166_s28 = scalar_lea.hbm %s1277_s1, %s708_s27 }
  0x24   : > { %s158_s29 = scalar_lea.vmem [#allocation5], %s687_s26  ;;  %s155_s7 = scalar_lea.sflag [#allocation6], %s1031_s25 }
  0x25   : > { %s168_s3 = sshll.u32 %s158_s29, 4  ;;  %s947_s30 = smov [#allocation5]   ;;  %s169_s3 = int_to_ptr.vmem [resolvable:$true] %s168_s3 }
  0x26   : > { %s845_s8 = scalar_lea.vmem %s169_s3, 512  ;;  %s850_s4 = sshll.u32 %s947_s30, 4  ;;  %s851_s4 = int_to_ptr.vmem [resolvable:$false] %s850_s4 }
  0x27   : > { %p846_p12 = scmp.ne.s32.totalorder %s169_s3, %s845_s8  ;;  %s852_s6 = scalar_lea.vmem %s851_s4, 1024 }
  0x28   : > { %p853_p1 = scmp.lt.s32.totalorder %s169_s3, %s851_s4  ;;  %p854_p2 = scmp.lt.s32.totalorder %s852_s6, %s845_s8 }
  0x29   : > { %p848_p6 = pnand %p846_p12, %p806_p3 }
  0x2a   : > { %p855_p4 = por %p854_p2, %p853_p1 }
  0x2b   : > { %p849_p7 = pneg %p848_p6 }
  0x2d   : > { %p856_p10 = pnand %p855_p4, %p849_p7 }
  0x2f   : > { %859 = shalt.err (!%p856_p10)
}
  0x30   : > { %723 = dma.hbm_to_vmem [thread:$0]  (!%p1040_p0), %s166_s28, 512, %s169_s3, %s155_s7  }
  0x31   : > { %177 = sbr.rel (%p1058_p5) target bundleno = 150 (0x96), region = 28  ;;  %s1074_s25 = sand.u32 (!%p1058_p5), 1, %s928_s10  }
  0x32   : > { %s694_s26 = sshll.u32 (!%p1058_p5), %s1074_s25, 5  ;;  %s180_s27 = scalar_lea.sflag (!%p1058_p5), [#allocation3], %s1074_s25 }
  0x33   : > { %s183_s15 = scalar_lea.vmem (!%p1058_p5), [#allocation2], %s694_s26 }
  0x36   : > { %911 = dma.done.wait (%p1013_p8), %s180_s27, 512  }
  0x37   : > { %913 = vsyncadd (%p1013_p8), %s180_s27, 4294966784  ;;  %s189_s5 = scalar_lea.sflag [#allocation6], %s1074_s25  ;;  %s192_s16 = scalar_lea.vmem [#allocation5], %s694_s26 }
  0x38   : > { %915 = dma.done.wait (%p1013_p8), %s189_s5, 512  }
  0x39   : > { %917 = vsyncadd (%p1013_p8), %s189_s5, 4294966784  ;;  %s1087_s18 = scalar_lea.vmem [#allocation7], %s694_s26  ;;  %v948_v0 = vmov 0.0   ;;  %v1093_v1 = vld [vmem:[%s183_s15] sm:$0xff]  ;;  %v1095_v2 = vld [vmem:[%s183_s15 + $0x8] sm:$0xff]  ;;  %v356_v39 = vlaneseq  ;;  %s710_s21 = sshll.u32 %s936_s12, 9 }
  0x3a   : > { %222 = vst [vmem:[%s1087_s18] sm:$0xff] %v948_v0  ;;  %223 = vst [vmem:[%s1087_s18 + $0x8] sm:$0xff] %v948_v0  ;;  %v1097_v3 = vld [vmem:[%s183_s15 + $0x10] sm:$0xff]  ;;  %v1099_v4 = vld [vmem:[%s183_s15 + $0x18] sm:$0xff]  ;;  %v234_v5 = vand.u32 2147483647, %v1093_v1  ;;  %v250_v58 = vmax.f32 %v1093_v1, 0.0  ;;  %s574_s29 = scalar_lea.hbm %s1278_s2, %s710_s21 }
  0x3b   : > { %224 = vst [vmem:[%s1087_s18 + $0x10] sm:$0xff] %v948_v0  ;;  %225 = vst [vmem:[%s1087_s18 + $0x18] sm:$0xff] %v948_v0  ;;  %v235_v6 = vand.u32 2147483647, %v1095_v2  ;;  %v236_v7 = vand.u32 2147483647, %v1097_v3 }
  0x3c   : > { %v237_v8 = vand.u32 2147483647, %v1099_v4  ;;  %v238_v9 = vsub.f32 0.0, %v234_v5  ;;  %v1105_v17 = vld [vmem:[%s192_s16] sm:$0xff]  ;;  %v1107_v18 = vld [vmem:[%s192_s16 + $0x8] sm:$0xff]  ;;  %v1109_v19 = vld [vmem:[%s192_s16 + $0x10] sm:$0xff] }
  0x3d   : > { %v239_v10 = vsub.f32 0.0, %v235_v6  ;;  %v240_v11 = vsub.f32 0.0, %v236_v7  ;;  %v1111_v20 = vld [vmem:[%s192_s16 + $0x18] sm:$0xff]  ;;  %v443_v21 = vrot.slane %v1105_v17, 4  ;;  %v449_v22 = vrot.slane %v1107_v18, 4  ;;  %s576_s19 = sshll.u32 %s1087_s18, 4  ;;  %s577_s19 = int_to_ptr.vmem [resolvable:$true] %s576_s19 }
  0x3e   : > { %v241_v12 = vsub.f32 0.0, %v237_v8  ;;  %v242_v13 = vmul.f32 1.442695, %v238_v9  ;;  %v455_v23 = vrot.slane %v1109_v19, 4  ;;  %v461_v24 = vrot.slane %v1111_v20, 4  ;;  %s562_s3 = scalar_lea.sflag [#allocation4], %s1074_s25 }
  0x3f   : > { %v244_v14 = vmul.f32 1.442695, %v239_v10  ;;  %v246_v15 = vmul.f32 1.442695, %v240_v11  ;;  %v444_v25 = vadd.f32 %v443_v21, %v1105_v17  ;;  %v450_v26 = vadd.f32 %v449_v22, %v1107_v18  ;;  %s860_s7 = scalar_lea.vmem %s577_s19, 512  ;;  %s950_s8 = smov [#allocation7]  }
  0x40   : > { %780 = vpow2.f32 %v242_v13  ;;  %v248_v16 = vmul.f32 1.442695, %v241_v12  ;;  %v456_v27 = vadd.f32 %v455_v23, %v1109_v19  ;;  %v462_v28 = vadd.f32 %v461_v24, %v1111_v20  ;;  %p861_p8 = scmp.ne.s32.totalorder %s577_s19, %s860_s7  ;;  %s864_s12 = sshll.u32 %s950_s8, 4  ;;  %s865_s12 = int_to_ptr.vmem [resolvable:$false] %s864_s12 }
  0x41   : > { %782 = vpow2.f32 %v244_v14  ;;  %v445_v29 = vrot.slane %v444_v25, 2  ;;  %v451_v30 = vrot.slane %v450_v26, 2  ;;  %v949_v37 = vmov 1966171168   ;;  %s866_s30 = scalar_lea.vmem %s865_s12, 1024  ;;  %p867_p13 = scmp.lt.s32.totalorder %s577_s19, %s865_s12 }
  0x42   : > { %784 = vpow2.f32 %v246_v15  ;;  %v457_v31 = vrot.slane %v456_v27, 2  ;;  %v463_v32 = vrot.slane %v462_v28, 2  ;;  %v354_v38 = vunpack.c.l.s4 %v949_v37  ;;  %p862_p0 = pnand %p861_p8, %p1017_p9  ;;  %p868_p5 = scmp.lt.s32.totalorder %s866_s30, %s860_s7 }
  0x43   : > { %786 = vpow2.f32 %v248_v16  ;;  %v446_v33 = vadd.f32 %v445_v29, %v444_v25  ;;  %v452_v34 = vadd.f32 %v451_v30, %v450_v26  ;;  %v357_v50 = vshrl.u32 %v356_v39, 7 }
  0x44   : > { %v458_v35 = vadd.f32 %v457_v31, %v456_v27  ;;  %v464_v36 = vadd.f32 %v463_v32, %v462_v28  ;;  %v355_v49 = vunpack.c.0.s8 %v354_v38  ;;  %v251_v61 = vmax.f32 %v1095_v2, 0.0  ;;  %v699_v31 = vld [vmem:[%s1087_s18 + $0x2] ss:$8 sm:$0xf]  ;;  %p863_p3 = pneg %p862_p0  ;;  %p869_p12 = por %p868_p5, %p867_p13 }
  0x45   : > { %v447_v41 = vrot.slane %v446_v33, 1  ;;  %v453_v42 = vrot.slane %v452_v34, 1  ;;  %v254_v62 = vmul.f32 %v1105_v17, %v1093_v1  ;;  %v255_v63 = vmul.f32 %v1107_v18, %v1095_v2 }
  0x46   : > { %v459_v45 = vrot.slane %v458_v35, 1  ;;  %v465_v46 = vrot.slane %v464_v36, 1  ;;  %v1135_v60 = vsub.s32 %v355_v49, %v357_v50  ;;  %v252_v0 = vmax.f32 %v1097_v3, 0.0  ;;  %p870_p6 = pnand %p869_p12, %p863_p3 }
  0x47   : > { %v448_v53 = vadd.f32 %v447_v41, %v446_v33  ;;  %v454_v54 = vadd.f32 %v453_v42, %v452_v34  ;;  %v253_v5 = vmax.f32 %v1099_v4, 0.0  ;;  %v256_v10 = vmul.f32 %v1109_v19, %v1097_v3 }
  0x48   : > { %v460_v56 = vadd.f32 %v459_v45, %v458_v35  ;;  %v466_v57 = vadd.f32 %v465_v46, %v464_v36  ;;  %v257_v11 = vmul.f32 %v1111_v20, %v1099_v4  ;;  %vm1154_vm0 = vcmp.lt.s32.totalorder %v356_v39, 512 }
  0x49   : > { %v471_v8 = vcombine.low %v448_v53, %v454_v54  ;;  %v258_v23 = vsub.f32 %v250_v58, %v254_v62  ;;  %v259_v27 = vsub.f32 %v251_v61, %v255_v63  ;;  %v260_v28 = vsub.f32 %v252_v0, %v256_v10 }
  0x4a   : > { %v472_v9 = vcombine.low %v460_v56, %v466_v57  ;;  %v261_v29 = vsub.f32 %v253_v5, %v257_v11  ;;  %vm302_vm1 = vcmp.ge.f32.partialorder %v1093_v1, 0.0  ;;  %vm303_vm3 = vcmp.ge.f32.partialorder %v1095_v2, 0.0 }
  0x4b   : > { %v479_v14 = vrot.slane %v471_v8, %v1135_v60  ;;  %vm304_vm6 = vcmp.ge.f32.partialorder %v1097_v3, 0.0  ;;  %vm305_vm7 = vcmp.ge.f32.partialorder %v1099_v4, 0.0 }
  0x4c   : > { %v486_v15 = vrot.slane %v472_v9, %v1135_v60 }
  0x4d   : > { %v1121_v40 = vpop.eup %780 }
  0x4e   : > { %v1123_v43 = vpop.eup %782  ;;  %v262_v44 = vadd.f32 1.0, %v1121_v40  ;;  %v265_v59 = vmul.f32 -0.5, %v1121_v40  ;;  %v268_v16 = vand.u32 2147483647, %v1121_v40  ;;  %v487_v26 = vcombine.low %v479_v14, %v486_v15 }
  0x4f   : > { %v1126_v47 = vpop.eup %784  ;;  %v271_v48 = vadd.f32 1.0, %v1123_v43  ;;  %v274_v6 = vmul.f32 -0.5, %v1123_v43  ;;  %v277_v24 = vand.u32 2147483647, %v1123_v43  ;;  %v306_v54 = vsel %vm302_vm1, 1.0, %v1121_v40 }
  0x50   : > { %v1129_v51 = vpop.eup %786  ;;  %788 = vlog2.f32 %v262_v44  ;;  %v280_v52 = vadd.f32 1.0, %v1126_v47  ;;  %v283_v7 = vmul.f32 -0.5, %v1126_v47  ;;  %v266_v12 = vadd.f32 1.0, %v265_v59 }
  0x51   : > { %790 = vlog2.f32 %v271_v48  ;;  %v289_v55 = vadd.f32 1.0, %v1129_v51  ;;  %v292_v13 = vmul.f32 -0.5, %v1129_v51  ;;  %v275_v21 = vadd.f32 1.0, %v274_v6 }
  0x52   : > { %792 = vlog2.f32 %v280_v52  ;;  %v284_v25 = vadd.f32 1.0, %v283_v7  ;;  %v286_v30 = vand.u32 2147483647, %v1126_v47  ;;  %v267_v32 = vmul.f32 %v1121_v40, %v266_v12 }
  0x53   : > { %794 = vlog2.f32 %v289_v55  ;;  %v293_v33 = vadd.f32 1.0, %v292_v13  ;;  %v494_v34 = vrot.slane %v487_v26, %v1135_v60  ;;  %vm1164_vm2 = vcmp.lt.f32.partialorder %v268_v16, 0.0004427343 }
  0x54   : > { %796 = vrcp.f32 %v262_v44  ;;  %v276_v37 = vmul.f32 %v1123_v43, %v275_v21  ;;  %v295_v38 = vand.u32 2147483647, %v1129_v51  ;;  %vm1171_vm4 = vcmp.lt.f32.partialorder %v277_v24, 0.0004427343 }
  0x55   : > { %798 = vrcp.f32 %v271_v48  ;;  %v285_v44 = vmul.f32 %v1126_v47, %v284_v25  ;;  %v496_v45 = vadd.f32 %v699_v31, %v494_v34  ;;  %vm1176_vm5 = vcmp.lt.f32.partialorder %v286_v30, 0.0004427343 }
  0x56   : > { %800 = vrcp.f32 %v280_v52  ;;  %v294_v53 = vmul.f32 %v1129_v51, %v293_v33  ;;  %vm1193_vm8 = vcmp.lt.f32.partialorder %v295_v38, 0.0004427343  ;;  %v307_v59 = vsel %vm303_vm3, 1.0, %v1123_v43 }
  0x57   : > { %802 = vrcp.f32 %v289_v55  ;;  %700 = vst.msk [vmem:[%s1087_s18 + $0x2] ss:$8 sm:$0xf] %vm1154_vm0, %v496_v45  ;;  %v308_v63 = vsel %vm304_vm6, 1.0, %v1126_v47  ;;  %v309_v7 = vsel %vm305_vm7, 1.0, %v1129_v51 }
  0x5d   : > { %v789_v35 = vpop.eup %788 }
  0x5e   : > { %v791_v39 = vpop.eup %790  ;;  %v264_v41 = vmul.f32 0.6931472, %v789_v35 }
  0x5f   : > { %v793_v46 = vpop.eup %792  ;;  %v273_v48 = vmul.f32 0.6931472, %v791_v39 }
  0x60   : > { %v270_v50 = vsel %vm1164_vm2, %v267_v32, %v264_v41  ;;  %v282_v52 = vmul.f32 0.6931472, %v793_v46  ;;  %v795_v55 = vpop.eup %794 }
  0x61   : > { %v279_v56 = vsel %vm1171_vm4, %v276_v37, %v273_v48  ;;  %v298_v58 = vadd.f32 %v270_v50, %v258_v23  ;;  %v797_v61 = vpop.eup %796  ;;  %v291_v40 = vmul.f32 0.6931472, %v795_v55 }
  0x62   : > { %v288_v1 = vsel %vm1176_vm5, %v285_v44, %v282_v52  ;;  %v299_v62 = vadd.f32 %v279_v56, %v259_v27  ;;  %v799_v0 = vpop.eup %798  ;;  %v318_v9 = vmul.f32 %v797_v61, %v306_v54 }
  0x63   : > { %v300_v5 = vadd.f32 %v288_v1, %v260_v28  ;;  %v323_v6 = vrot.slane %v298_v58, 4  ;;  %v801_v8 = vpop.eup %800  ;;  %v297_v2 = vsel %vm1193_vm8, %v294_v53, %v291_v40  ;;  %v319_v10 = vmul.f32 %v799_v0, %v307_v59 }
  0x64   : > { %v329_v43 = vrot.slane %v299_v62, 4  ;;  %v803_v11 = vpop.eup %802  ;;  %v301_v12 = vadd.f32 %v297_v2, %v261_v29  ;;  %v320_v3 = vmul.f32 %v801_v8, %v308_v63  ;;  %v385_v16 = vrot.slane %v318_v9, 4 }
  0x65   : > { %v324_v13 = vadd.f32 %v323_v6, %v298_v58  ;;  %v335_v14 = vrot.slane %v300_v5, 4  ;;  %v321_v15 = vmul.f32 %v803_v11, %v309_v7  ;;  %v391_v21 = vrot.slane %v319_v10, 4 }
  0x66   : > { %v330_v47 = vadd.f32 %v329_v43, %v299_v62  ;;  %v341_v4 = vrot.slane %v301_v12, 4  ;;  %v397_v51 = vrot.slane %v320_v3, 4  ;;  %v386_v26 = vadd.f32 %v385_v16, %v318_v9 }
  0x67   : > { %v325_v23 = vrot.slane %v324_v13, 2  ;;  %v336_v24 = vadd.f32 %v335_v14, %v300_v5  ;;  %v392_v27 = vadd.f32 %v391_v21, %v319_v10  ;;  %v403_v28 = vrot.slane %v321_v15, 4 }
  0x68   : > { %v331_v25 = vrot.slane %v330_v47, 2  ;;  %v342_v32 = vadd.f32 %v341_v4, %v301_v12  ;;  %v398_v33 = vadd.f32 %v397_v51, %v320_v3  ;;  %v387_v34 = vrot.slane %v386_v26, 2  ;;  %v322_v51 = vld [vmem:[%s1087_s18] ss:$8 sm:$0xf] }
  0x69   : > { %v326_v30 = vadd.f32 %v325_v23, %v324_v13  ;;  %v337_v31 = vrot.slane %v336_v24, 2  ;;  %v393_v35 = vrot.slane %v392_v27, 2  ;;  %v404_v36 = vadd.f32 %v403_v28, %v321_v15  ;;  %v697_v28 = vld [vmem:[%s1087_s18 + $0x1] ss:$8 sm:$0xf] }
  0x6a   : > { %v332_v29 = vadd.f32 %v331_v25, %v330_v47  ;;  %v343_v39 = vrot.slane %v342_v32, 2  ;;  %v399_v41 = vrot.slane %v398_v33, 2  ;;  %v388_v44 = vadd.f32 %v387_v34, %v386_v26 }
  0x6b   : > { %v327_v37 = vrot.slane %v326_v30, 1  ;;  %v338_v38 = vadd.f32 %v337_v31, %v336_v24  ;;  %v394_v45 = vadd.f32 %v393_v35, %v392_v27  ;;  %v405_v46 = vrot.slane %v404_v36, 2 }
  0x6c   : > { %v333_v42 = vrot.slane %v332_v29, 1  ;;  %v344_v50 = vadd.f32 %v343_v39, %v342_v32  ;;  %v400_v52 = vadd.f32 %v399_v41, %v398_v33  ;;  %v389_v54 = vrot.slane %v388_v44, 1 }
  0x6d   : > { %v328_v48 = vadd.f32 %v327_v37, %v326_v30  ;;  %v339_v49 = vrot.slane %v338_v38, 1  ;;  %v395_v55 = vrot.slane %v394_v45, 1  ;;  %v406_v56 = vadd.f32 %v405_v46, %v404_v36 }
  0x6e   : > { %v334_v53 = vadd.f32 %v333_v42, %v332_v29  ;;  %v345_v58 = vrot.slane %v344_v50, 1  ;;  %v401_v59 = vrot.slane %v400_v52, 1  ;;  %v501_v61 = vmul.f32 %v318_v9, %v1105_v17 }
  0x6f   : > { %v340_v57 = vadd.f32 %v339_v49, %v338_v38  ;;  %v390_v40 = vadd.f32 %v389_v54, %v388_v44  ;;  %v396_v62 = vadd.f32 %v395_v55, %v394_v45  ;;  %v407_v63 = vrot.slane %v406_v56, 1 }
  0x70   : > { %v351_v1 = vcombine.low %v328_v48, %v334_v53  ;;  %v346_v0 = vadd.f32 %v345_v58, %v344_v50  ;;  %v402_v5 = vadd.f32 %v401_v59, %v400_v52  ;;  %v502_v6 = vmul.f32 %v319_v10, %v1107_v18  ;;  %v701_v53 = vld [vmem:[%s1087_s18 + $0x3] ss:$8 sm:$0xf] }
  0x71   : > { %v503_v7 = vmul.f32 %v320_v3, %v1109_v19  ;;  %v408_v2 = vadd.f32 %v407_v63, %v406_v56  ;;  %v413_v43 = vcombine.low %v390_v40, %v396_v62  ;;  %v504_v11 = vmul.f32 %v321_v15, %v1111_v20 }
  0x72   : > { %v359_v8 = vrot.slane %v351_v1, %v1135_v60  ;;  %v352_v12 = vcombine.low %v340_v57, %v346_v0  ;;  %v505_v13 = vrot.slane %v501_v61, 4  ;;  %v511_v17 = vrot.slane %v502_v6, 4 }
  0x73   : > { %v517_v9 = vrot.slane %v503_v7, 4  ;;  %v414_v14 = vcombine.low %v402_v5, %v408_v2  ;;  %v421_v47 = vrot.slane %v413_v43, %v1135_v60  ;;  %v523_v16 = vrot.slane %v504_v11, 4 }
  0x74   : > { %v366_v18 = vrot.slane %v352_v12, %v1135_v60  ;;  %v506_v10 = vadd.f32 %v505_v13, %v501_v61  ;;  %v512_v19 = vadd.f32 %v511_v17, %v502_v6 }
  0x75   : > { %v518_v3 = vadd.f32 %v517_v9, %v503_v7  ;;  %v428_v21 = vrot.slane %v414_v14, %v1135_v60  ;;  %v524_v23 = vadd.f32 %v523_v16, %v504_v11 }
  0x76   : > { %v367_v24 = vcombine.low %v359_v8, %v366_v18  ;;  %v507_v20 = vrot.slane %v506_v10, 2  ;;  %v513_v15 = vrot.slane %v512_v19, 2 }
  0x77   : > { %v519_v4 = vrot.slane %v518_v3, 2  ;;  %v429_v25 = vcombine.low %v421_v47, %v428_v21  ;;  %v525_v26 = vrot.slane %v524_v23, 2 }
  0x78   : > { %v374_v27 = vrot.slane %v367_v24, %v1135_v60  ;;  %v508_v30 = vadd.f32 %v507_v20, %v506_v10  ;;  %v514_v31 = vadd.f32 %v513_v15, %v512_v19 }
  0x79   : > { %v520_v32 = vadd.f32 %v519_v4, %v518_v3  ;;  %v436_v33 = vrot.slane %v429_v25, %v1135_v60  ;;  %v526_v29 = vadd.f32 %v525_v26, %v524_v23 }
  0x7a   : > { %v376_v34 = vadd.f32 %v374_v27, %v322_v51  ;;  %v509_v35 = vrot.slane %v508_v30, 1  ;;  %v515_v36 = vrot.slane %v514_v31, 1 }
  0x7b   : > { %v521_v37 = vrot.slane %v520_v32, 1  ;;  %v438_v38 = vadd.f32 %v697_v28, %v436_v33  ;;  %v527_v39 = vrot.slane %v526_v29, 1 }
  0x7c   : > { %381 = vst.msk [vmem:[%s1087_s18] ss:$8 sm:$0xf] %vm1154_vm0, %v376_v34  ;;  %v510_v41 = vadd.f32 %v509_v35, %v508_v30  ;;  %v516_v42 = vadd.f32 %v515_v36, %v514_v31 }
  0x7d   : > { %v522_v44 = vadd.f32 %v521_v37, %v520_v32  ;;  %698 = vst.msk [vmem:[%s1087_s18 + $0x1] ss:$8 sm:$0xf] %vm1154_vm0, %v438_v38  ;;  %v528_v45 = vadd.f32 %v527_v39, %v526_v29 }
  0x7e   : > { %v533_v46 = vcombine.low %v510_v41, %v516_v42 }
  0x7f   : > { %v534_v48 = vcombine.low %v522_v44, %v528_v45 }
  0x80   : > { %v541_v49 = vrot.slane %v533_v46, %v1135_v60 }
  0x81   : > { %v548_v50 = vrot.slane %v534_v48, %v1135_v60 }
  0x83   : > { %v549_v52 = vcombine.low %v541_v49, %v548_v50 }
  0x85   : > { %v556_v54 = vrot.slane %v549_v52, %v1135_v60 }
  0x87   : > { %v558_v55 = vadd.f32 %v701_v53, %v556_v54 }
  0x89   : > { %702 = vst.msk [vmem:[%s1087_s18 + $0x3] ss:$8 sm:$0xf] %vm1154_vm0, %v558_v55 }
  0x8a   : > { %873 = shalt.err (!%p870_p6)
}
  0x8b   : > { %s874_s4 = scalar_lea.hbm %s574_s29, 512  ;;  %s878_s26 = scalar_lea.hbm %s1278_s2, 1024 }
  0x8c   : > { %p875_p7 = scmp.ne.s32.totalorder %s574_s29, %s874_s4  ;;  %p879_p4 = scmp.lt.s32.totalorder %s574_s29, %s1278_s2 }
  0x8d   : > { %p880_p10 = scmp.lt.s32.totalorder %s878_s26, %s874_s4 }
  0x8e   : > { %p876_p1 = pnand %p875_p7, %p1017_p9 }
  0x8f   : > { %p881_p8 = por %p880_p10, %p879_p4 }
  0x90   : > { %p877_p2 = pneg %p876_p1 }
  0x92   : > { %p882_p0 = pnand %p881_p8, %p877_p2 }
  0x94   : > { %885 = shalt.err (!%p882_p0)
}
  0x95   : > { %715 = dma.vmem_to_hbm [thread:$0]  (%p1017_p9), %s577_s19, 512, %s574_s29, %s562_s3  }
  0x96 PF: > { %s588_s5 = sand.u32 1, %s924_s9   ;;  %p1295_p3 = scmp.ge.s32.totalorder %s944_s14, 2 }
  0x97   : > { %s589_s16 = scalar_lea.sflag [#allocation4], %s588_s5 }
  0x98   : > { %p725_p13 = pnand %p1295_p3, %p1024_p11 }
  0x9a   : > { %p726_p5 = pneg %p725_p13 }
  0x9c   : > { %919 = dma.done.wait (%p726_p5), %s589_s16, 512  }
  0x9d   : > { %921 = vsyncadd (%p726_p5), %s589_s16, 4294966784  ;;  %s21_s14 = sadd.s32 1, %s944_s14   ;;  %s1296_s9 = smov %s928_s10 }
  0x9e   : > { %p18_p12 = scmp.ge.s32.totalorder %s21_s14, 4   ;;  %s1297_s10 = smov %s932_s11 }
  0x9f   : > { %s1298_s11 = smov %s1022_s23  ;;  %s1299_s12 = smov %s940_s13 }
  0xa0   : > { %s1300_s13 = smov %s1302_s17  ;;  %20 = sbr.rel (!%p18_p12) target bundleno = 8 (0x8), region = 93 }
  0xa5   :  { %594 = vsyncpa [#allocation3], 1 }
  0xa6   :  { %596 = vsyncpa [#allocation3 + $0x1], 1 }
  0xa7   :  { %597 = vsyncpa [#allocation6], 1 }
  0xa8   :  { %599 = vsyncpa [#allocation6 + $0x1], 1 }
  0xa9   :  { %600 = vsyncpa [#allocation4], 1 }
  0xaa   :  { %602 = vsyncpa [#allocation4 + $0x1], 1 }

</bundles_post_ra>
